<compile_context>
chip_gen: v7x
topology: tpu7x:2x2x1
jax: 0.10.0
libtpu: 0.0.40
codegen_flags: <defaults>
</compile_context>

<pallas_src>
import functools
import math

import jax
import jax.numpy as jnp
from jax.experimental import pallas as pl
from jax.experimental.pallas import tpu as pltpu


_VMEM_LIMIT = 48 * 1024 * 1024  # explicit scoped-VMEM budget (fits v5e/v6e/v7x)


# --------------------------------------------------------------------------
# Kernel 1: tiled matmul + bias (patch projection & classifier head)
# --------------------------------------------------------------------------
def _matmul_bias_kernel(x_ref, w_ref, b_ref, o_ref, acc_ref):
    @pl.when(pl.program_id(2) == 0)
    def _():
        acc_ref[...] = jnp.zeros_like(acc_ref)

    acc_ref[...] += jnp.dot(x_ref[...], w_ref[...],
                            preferred_element_type=jnp.float32)

    @pl.when(pl.program_id(2) == pl.num_programs(2) - 1)
    def _():
        o_ref[...] = (acc_ref[...] + b_ref[...]).astype(o_ref.dtype)


def _fit_tile(dim, tile):
    # Clamp the tile to the full dim when the dim is small or not divisible.
    # TODO(synk): ragged tiling for huge non-divisible dims.
    if dim <= tile or dim % tile != 0:
        return dim
    return tile


def matmul_bias(x, w, b, *, tm=512, tn=256, tk=256):
    """out = x @ w + b, bf16 MXU operands, f32 accumulation/output."""
    M, K = x.shape
    N = w.shape[1]
    tm, tn, tk = _fit_tile(M, tm), _fit_tile(N, tn), _fit_tile(K, tk)

    return pl.pallas_call(
        _matmul_bias_kernel,
        out_shape=jax.ShapeDtypeStruct((M, N), jnp.float32),
        grid=(M // tm, N // tn, K // tk),
        in_specs=[
            pl.BlockSpec((tm, tk), lambda i, j, k: (i, k)),
            pl.BlockSpec((tk, tn), lambda i, j, k: (k, j)),
            pl.BlockSpec((1, tn), lambda i, j, k: (0, j)),
        ],
        out_specs=pl.BlockSpec((tm, tn), lambda i, j, k: (i, j)),
        scratch_shapes=[pltpu.VMEM((tm, tn), jnp.float32)],
        compiler_params=pltpu.CompilerParams(
            dimension_semantics=("parallel", "parallel", "arbitrary"),
            vmem_limit_bytes=_VMEM_LIMIT,
        ),
    )(x.astype(jnp.bfloat16), w.astype(jnp.bfloat16),
      b.reshape(1, N).astype(jnp.float32))


# --------------------------------------------------------------------------
# Kernel 2: full transformer encoder STACK (all layers fused into one call).
# Grid = (batch, layer); the layer axis is "arbitrary" and the output block
# index is constant across it, so the (S, D) sequence stays resident in VMEM
# and the shared weights are DMA'd once instead of per layer / per call.
# --------------------------------------------------------------------------
def _encoder_stack_kernel(
    x_ref,
    ln1_g_ref, ln1_b_ref,
    wqkv_ref, bqkv_ref, wo_ref, bo_ref,
    ln2_g_ref, ln2_b_ref,
    w1_ref, b1_ref, w2_ref, b2_ref,
    o_ref,
    *, num_heads,
):
    # Layer 0: seed the resident output block from the input sequence.
    @pl.when(pl.program_id(1) == 0)
    def _():
        o_ref[...] = x_ref[...]

    x = o_ref[0].astype(jnp.float32)          # (S, D) residual stream, f32
    S, D = x.shape
    H = num_heads
    hd = D // H
    scale = 1.0 / math.sqrt(hd)

    def layer_norm(v, g_ref, b_ref):          # f32 arithmetic (v5e-safe)
        mu = jnp.mean(v, axis=-1, keepdims=True)
        var = jnp.mean((v - mu) ** 2, axis=-1, keepdims=True)
        return (v - mu) * jax.lax.rsqrt(var + 1e-5) * g_ref[...] + b_ref[...]

    # ---------------- multi-head self attention (pre-LN, head-batched) -----
    h1 = layer_norm(x, ln1_g_ref, ln1_b_ref).astype(jnp.bfloat16)
    # One hoisted broadcast feeding the fused Q/K/V projection
    # (JAX does not CSE broadcast_in_dim, so broadcast exactly once).
    h3 = jnp.broadcast_to(h1[None], (3 * H, S, D))          # (3H, S, D) bf16

    # Fused per-head Q/K/V: (3H,S,D) x (3H,D,hd) -> (3H,S,hd); full K=D
    # contraction per head, no lane slicing, no in-kernel head relayouts.
    qkv = (jnp.einsum("gsd,gde->gse", h3, wqkv_ref[...],
                      preferred_element_type=jnp.float32)
           + bqkv_ref[...])                                  # (3H, S, hd) f32
    q = qkv[0:H] * scale          # fold softmax scale into the smaller tensor
    k = qkv[H:2 * H]
    v = qkv[2 * H:3 * H]

    # Head-batched attention scores / softmax / PV.
    s = jnp.einsum("hqe,hke->hqk",
                   q.astype(jnp.bfloat16), k.astype(jnp.bfloat16),
                   preferred_element_type=jnp.float32)       # (H, S, S)
    s = s - jnp.max(s, axis=-1, keepdims=True)
    p = jnp.exp(s)
    p = p * pl.reciprocal(jnp.sum(p, axis=-1, keepdims=True), approx=True)
    ctx = jnp.einsum("hqk,hke->hqe",
                     p.astype(jnp.bfloat16), v.astype(jnp.bfloat16),
                     preferred_element_type=jnp.float32)     # (H, S, hd)

    # Output projection: per-head (S,hd)@(hd,D) summed over heads.
    # Equivalent to concat(heads) @ wo but avoids any cross-lane concat.
    attn = (jnp.einsum("hqe,hed->hqd",
                       ctx.astype(jnp.bfloat16), wo_ref[...],
                       preferred_element_type=jnp.float32).sum(axis=0)
            + bo_ref[...])                                   # (S, D) f32
    # TODO(synk): dropout (p=0.1) omitted — identity in inference mode.
    x = x + attn

    # ---------------- feed-forward (pre-LN) ----------------
    h2 = layer_norm(x, ln2_g_ref, ln2_b_ref).astype(jnp.bfloat16)
    f = jnp.dot(h2, w1_ref[...], preferred_element_type=jnp.float32) + b1_ref[...]
    # TODO(synk): torch nn.GELU defaults to exact erf; tanh approximation used
    # here (EUP-friendly); reference Encoder_block definition not provided.
    f = jax.nn.gelu(f, approximate=True).astype(jnp.bfloat16)
    f = jnp.dot(f, w2_ref[...], preferred_element_type=jnp.float32) + b2_ref[...]
    x = x + f

    o_ref[0] = x.astype(o_ref.dtype)


def encoder_stack(x, p, num_layers, num_heads):
    B, S, D = x.shape
    H = num_heads
    hd = D // H
    d_ff = p["w1"].shape[1]

    # One-time weight re-layout in plain JAX (outside the kernel):
    # stacked per-head (3H, D, hd) QKV tensor and (H, hd, D) output-projection
    # tensor so the kernel never slices lanes or concatenates heads.
    def per_head_w(w):                       # (D, D) -> (H, D, hd)
        return jnp.transpose(w.reshape(D, H, hd), (1, 0, 2))

    def per_head_b(b):                       # (D,) -> (H, 1, hd)
        return b.reshape(H, hd)[:, None, :]

    wqkv = jnp.concatenate(
        [per_head_w(p["wq"]), per_head_w(p["wk"]), per_head_w(p["wv"])],
        axis=0).astype(jnp.bfloat16)                         # (3H, D, hd)
    bqkv = jnp.concatenate(
        [per_head_b(p["bq"]), per_head_b(p["bk"]), per_head_b(p["bv"])],
        axis=0).astype(jnp.float32)                          # (3H, 1, hd)
    wo_h = p["wo"].reshape(H, hd, D).astype(jnp.bfloat16)    # (H, hd, D)

    weight_args = [
        p["ln1_g"].reshape(1, D), p["ln1_b"].reshape(1, D),
        wqkv, bqkv,
        wo_h, p["bo"].reshape(1, D),
        p["ln2_g"].reshape(1, D), p["ln2_b"].reshape(1, D),
        p["w1"].astype(jnp.bfloat16), p["b1"].reshape(1, d_ff),
        p["w2"].astype(jnp.bfloat16), p["b2"].reshape(1, D),
    ]

    x_spec = pl.BlockSpec((1, S, D), lambda b, l: (b, 0, 0))
    w_specs = [
        pl.BlockSpec(a.shape, (lambda b, l, nd=a.ndim: (0,) * nd))
        for a in weight_args
    ]
    kern = functools.partial(_encoder_stack_kernel, num_heads=num_heads)

    return pl.pallas_call(
        kern,
        out_shape=jax.ShapeDtypeStruct((B, S, D), jnp.float32),
        grid=(B, num_layers),
        in_specs=[x_spec] + w_specs,
        out_specs=pl.BlockSpec((1, S, D), lambda b, l: (b, 0, 0)),
        compiler_params=pltpu.CompilerParams(
            dimension_semantics=("parallel", "arbitrary"),
            vmem_limit_bytes=_VMEM_LIMIT,
        ),
    )(x, *weight_args)


# --------------------------------------------------------------------------
# Glue (reshapes, PE table, parameter init)
# --------------------------------------------------------------------------
def extract_patches(x, p):
    # x: (B, C, H, W) NCHW, same as PyTorch; -> (B, num_patches, C*p*p)
    B, C, H, W = x.shape
    x = x.reshape(B, C, H // p, p, W // p, p)
    x = x.transpose(0, 2, 4, 1, 3, 5)       # (B, H/p, W/p, C, p, p)
    return x.reshape(B, (H // p) * (W // p), C * p * p)


def sinusoidal_pe(seq_len, d):
    pos = jnp.arange(seq_len, dtype=jnp.float32)[:, None]
    i = jnp.arange(0, d, 2, dtype=jnp.float32)
    div = jnp.exp(-jnp.log(10000.0) * i / d)
    pe = jnp.zeros((seq_len, d), jnp.float32)
    pe = pe.at[:, 0::2].set(jnp.sin(pos * div))
    pe = pe.at[:, 1::2].set(jnp.cos(pos * div))
    return pe


def init_params(key, embed, d_ff, num_classes):
    keys = jax.random.split(key, 10)

    def w(k, shape):
        return jax.random.normal(k, shape, jnp.float32) * 0.02

    return {
        "w_patch": w(keys[0], (embed, embed)),
        "b_patch": jnp.zeros((embed,), jnp.float32),
        "cls": w(keys[1], (1, 1, embed)),
        "enc": {
            "ln1_g": jnp.ones((embed,), jnp.float32),
            "ln1_b": jnp.zeros((embed,), jnp.float32),
            "wq": w(keys[2], (embed, embed)), "bq": jnp.zeros((embed,), jnp.float32),
            "wk": w(keys[3], (embed, embed)), "bk": jnp.zeros((embed,), jnp.float32),
            "wv": w(keys[4], (embed, embed)), "bv": jnp.zeros((embed,), jnp.float32),
            "wo": w(keys[5], (embed, embed)), "bo": jnp.zeros((embed,), jnp.float32),
            "ln2_g": jnp.ones((embed,), jnp.float32),
            "ln2_b": jnp.zeros((embed,), jnp.float32),
            "w1": w(keys[6], (embed, d_ff)), "b1": jnp.zeros((d_ff,), jnp.float32),
            "w2": w(keys[7], (d_ff, embed)), "b2": jnp.zeros((embed,), jnp.float32),
        },
        "w_head": w(keys[8], (embed, num_classes)),
        "b_head": jnp.zeros((num_classes,), jnp.float32),
    }


def vit_forward(x, params, num_layers, num_heads, patch_size):
    B = x.shape[0]
    patches = extract_patches(x, patch_size)                  # (B, N, E)
    N, E = patches.shape[1], patches.shape[2]

    # Patch embedding projection (== Conv2d(k=patch, stride=patch)), tiled Pallas.
    # NOTE: output lane dim E is a model hyperparameter; for real runs choose E
    # as a multiple of 128 per vreg geometry.
    flat = patches.reshape(B * N, E)
    emb = matmul_bias(flat, params["w_patch"], params["b_patch"]).reshape(B, N, E)

    # Prepend CLS token, add sinusoidal positional encoding.
    cls = jnp.broadcast_to(params["cls"], (B, 1, E))
    seq = jnp.concatenate([cls, emb], axis=1)                 # (B, N+1, E)
    seq = seq + sinusoidal_pe(N + 1, E)[None]

    # Shared encoder block applied num_layers times, fused into one pallas_call
    # (weight sharing as in the torch module).
    # TODO(synk): no final LayerNorm before the head — reference Encoder_block /
    # ViT definition unspecified.
    seq = encoder_stack(seq, params["enc"], num_layers, num_heads)

    # Classification head on the CLS token. Pad the output lane dim to a
    # multiple of 128 for lane-dense stores, slice back in the wrapper.
    num_classes = params["w_head"].shape[1]
    n_pad = ((num_classes + 127) // 128) * 128
    w_head_p = jnp.zeros((E, n_pad), jnp.float32).at[:, :num_classes].set(params["w_head"])
    b_head_p = jnp.zeros((n_pad,), jnp.float32).at[:num_classes].set(params["b_head"])
    logits = matmul_bias(seq[:, 0], w_head_p, b_head_p)[:, :num_classes]
    return logits


if __name__ == "__main__":
    res, num_classes = 16, 10
    d_ff, num_layers, num_heads = 128, 2, 8
    patch_size, in_channel = 4, 4
    embed = in_channel * patch_size * patch_size              # 64

    key = jax.random.PRNGKey(0)
    kx, kp = jax.random.split(key)
    x = jax.random.normal(kx, (2, in_channel, res, res), jnp.float32)  # NCHW
    params = init_params(kp, embed, d_ff, num_classes)

    out = vit_forward(x, params, num_layers, num_heads, patch_size)
    jax.block_until_ready(out)
    assert out.shape == (2, num_classes)
    print("KERNEL_OK")
</pallas_src>

<mosaic_0001>
module attributes {stable_mosaic.version = 11 : i64} {
  func.func @_matmul_bias_kernel(%arg0: i32, %arg1: i32, %arg2: i32, %arg3: memref<32x64xbf16, #tpu.memory_space<vmem>>, %arg4: memref<64x64xbf16, #tpu.memory_space<vmem>>, %arg5: memref<1x64xf32, #tpu.memory_space<vmem>>, %arg6: memref<32x64xf32, #tpu.memory_space<vmem>>, %arg7: memref<32x64xf32, #tpu.memory_space<vmem>>) attributes {dimension_semantics = [#tpu.dimension_semantics<parallel>, #tpu.dimension_semantics<parallel>, #tpu.dimension_semantics<arbitrary>], iteration_bounds = array<i64: 1, 1, 1>, scalar_prefetch = 0 : i64, scratch_operands = 1 : i64, tpu.core_type = #tpu.core_type<tc>, window_params = [{transform_indices = @transform_0, window_bounds = array<i64: 32, 64>}, {transform_indices = @transform_1, window_bounds = array<i64: 64, 64>}, {transform_indices = @transform_2, window_bounds = array<i64: 1, 64>}, {transform_indices = @transform_3, window_bounds = array<i64: 32, 64>}]} {
    %c0_i32 = arith.constant 0 : i32
    %0 = arith.cmpi eq, %arg2, %c0_i32 : i32
    %1 = arith.extui %0 : i1 to i32
    %c0_i32_0 = arith.constant 0 : i32
    %2 = arith.cmpi ne, %1, %c0_i32_0 : i32
    scf.if %2 {
      %cst_10 = arith.constant 0.000000e+00 : f32
      %12 = vector.broadcast %cst_10 : f32 to vector<32x64xf32>
      %c0_11 = arith.constant 0 : index
      %c0_12 = arith.constant 0 : index
      %13 = vector.load %arg7[%c0_11, %c0_12] : memref<32x64xf32, #tpu.memory_space<vmem>>, vector<32x64xf32>
      tpu.vector_store %arg7[%c0_11, %c0_12], %12 {strides = array<i32>} : memref<32x64xf32, #tpu.memory_space<vmem>>, vector<32x64xf32>,
    } else {
    }
    %c0 = arith.constant 0 : index
    %c0_1 = arith.constant 0 : index
    %3 = vector.load %arg7[%c0, %c0_1] : memref<32x64xf32, #tpu.memory_space<vmem>>, vector<32x64xf32>
    %c0_2 = arith.constant 0 : index
    %c0_3 = arith.constant 0 : index
    %4 = vector.load %arg3[%c0_2, %c0_3] : memref<32x64xbf16, #tpu.memory_space<vmem>>, vector<32x64xbf16>
    %c0_4 = arith.constant 0 : index
    %c0_5 = arith.constant 0 : index
    %5 = vector.load %arg4[%c0_4, %c0_5] : memref<64x64xbf16, #tpu.memory_space<vmem>>, vector<64x64xbf16>
    %cst = arith.constant dense<0.000000e+00> : vector<32x64xf32>
    %6 = tpu.matmul %4, %5, %cst {dimension_numbers = #tpu.dot_dimension_numbers<[1], [0], [0], [1], [0, 0, 1, 1], [], []>} : vector<32x64xbf16>, vector<64x64xbf16>, vector<32x64xf32> -> vector<32x64xf32>
    %7 = arith.addf %3, %6 : vector<32x64xf32>
    %c0_6 = arith.constant 0 : index
    %c0_7 = arith.constant 0 : index
    %8 = vector.load %arg7[%c0_6, %c0_7] : memref<32x64xf32, #tpu.memory_space<vmem>>, vector<32x64xf32>
    tpu.vector_store %arg7[%c0_6, %c0_7], %7 {strides = array<i32>} : memref<32x64xf32, #tpu.memory_space<vmem>>, vector<32x64xf32>,
    %c0_i32_8 = arith.constant 0 : i32
    %9 = arith.cmpi eq, %arg2, %c0_i32_8 : i32
    %10 = arith.extui %9 : i1 to i32
    %c0_i32_9 = arith.constant 0 : i32
    %11 = arith.cmpi ne, %10, %c0_i32_9 : i32
    scf.if %11 {
      %c0_10 = arith.constant 0 : index
      %c0_11 = arith.constant 0 : index
      %12 = vector.load %arg7[%c0_10, %c0_11] : memref<32x64xf32, #tpu.memory_space<vmem>>, vector<32x64xf32>
      %c0_12 = arith.constant 0 : index
      %c0_13 = arith.constant 0 : index
      %13 = vector.load %arg5[%c0_12, %c0_13] : memref<1x64xf32, #tpu.memory_space<vmem>>, vector<1x64xf32>
      %14 = vector.broadcast %13 : vector<1x64xf32> to vector<32x64xf32>
      %15 = arith.addf %12, %14 : vector<32x64xf32>
      %c0_14 = arith.constant 0 : index
      %c0_15 = arith.constant 0 : index
      %16 = vector.load %arg6[%c0_14, %c0_15] : memref<32x64xf32, #tpu.memory_space<vmem>>, vector<32x64xf32>
      tpu.vector_store %arg6[%c0_14, %c0_15], %15 {strides = array<i32>} : memref<32x64xf32, #tpu.memory_space<vmem>>, vector<32x64xf32>,
    } else {
    }
    return
  }
  func.func @transform_0(%arg0: i32, %arg1: i32, %arg2: i32) -> (i32, i32) {
    %c0_i32 = arith.constant 0 : i32
    return %arg0, %arg2 : i32, i32
  }
  func.func @transform_1(%arg0: i32, %arg1: i32, %arg2: i32) -> (i32, i32) {
    %c0_i32 = arith.constant 0 : i32
    return %arg2, %arg1 : i32, i32
  }
  func.func @transform_2(%arg0: i32, %arg1: i32, %arg2: i32) -> (i32, i32) {
    %c0_i32 = arith.constant 0 : i32
    %c0_i32_0 = arith.constant 0 : i32
    return %c0_i32, %arg1 : i32, i32
  }
  func.func @transform_3(%arg0: i32, %arg1: i32, %arg2: i32) -> (i32, i32) {
    %c0_i32 = arith.constant 0 : i32
    return %arg0, %arg1 : i32, i32
  }
}

</mosaic_0001>

<bundles_post_ra>
// kernel: tpu_custom_call.1
= control target key start
LH: loop header
LB: loop body
LE: loop exit
PB: predicated region body
PF: predicated region fallthrough
CT: control target
= control target key end

     0   :  { %8 = vsyncpa [#allocation4], 0  ;;  %s401_s0 = inlined_call_operand.hbm [shape: bf16[32,64], index: 0, kind: input, shape index: {}]   ;;  %s402_s1 = inlined_call_operand.hbm [shape: bf16[64,64], index: 1, kind: input, shape index: {}]   ;;  %s403_s2 = inlined_call_operand.vmem [shape: f32[1,64], index: 2, kind: input, shape index: {}]   ;;  %s404_s3 = inlined_call_operand.hbm [shape: f32[32,64], index: 3, kind: output, shape index: {}]  }
   0x1   :  { %9 = vsyncpa [#allocation7], 0 }
   0x2   :  { %10 = vsyncpa [#allocation5], 0  ;;  %s320_s12 = smov [#allocation3]   ;;  %s248_s16 = scalar_lea.hbm %s401_s0, 256 }
   0x3   :  { %s16_s13 = sshll.u32 %s320_s12, 4  ;;  %p249_p0 = scmp.ne.s32.totalorder %s401_s0, %s248_s16  ;;  %s17_s13 = int_to_ptr.vmem [resolvable:$true] %s16_s13 }
   0x4   :  { %p252_p1 = scmp.lt.u32.totalorder %s248_s16, %s401_s0 }
   0x6   :  { %p254_p2 = pnand %p252_p1, %p249_p0 }
   0x8   :  { %257 = shalt.err (!%p254_p2)
}
   0x9   :  { %s258_s21 = scalar_lea.vmem %s17_s13, 256  ;;  %p263_p4 = scmp.lt.s32.totalorder %s17_s13, %s17_s13 }
   0xa   :  { %p259_p3 = scmp.ne.s32.totalorder %s17_s13, %s258_s21  ;;  %p264_p5 = scmp.lt.s32.totalorder %s258_s21, %s258_s21 }
   0xc   :  { %p265_p6 = por %p264_p5, %p263_p4 }
   0xe   :  { %p266_p7 = pnand %p265_p6, %p259_p3 }
  0x10   :  { %269 = shalt.err (!%p266_p7)
}
  0x11   :  { %s321_s22 = smov 64   ;;  %s322_s23 = smov 4  }
  0x12   :  { %22 = dma.hbm_to_vmem [thread:$0]  %s401_s0, 256, %s17_s13, [#allocation4], %s321_s22, %s321_s22, %s322_s23  }
  0x13   :  { %s323_s26 = smov [#allocation6]   ;;  %s270_s30 = scalar_lea.hbm %s402_s1, 512 }
  0x14   :  { %s28_s27 = sshll.u32 %s323_s26, 4  ;;  %p271_p8 = scmp.ne.s32.totalorder %s402_s1, %s270_s30  ;;  %s29_s27 = int_to_ptr.vmem [resolvable:$true] %s28_s27 }
  0x15   :  { %p274_p9 = scmp.lt.u32.totalorder %s270_s30, %s402_s1 }
  0x17   :  { %p276_p10 = pnand %p274_p9, %p271_p8 }
  0x19   :  { %279 = shalt.err (!%p276_p10)
}
  0x1a   :  { %s280_s8 = scalar_lea.vmem %s29_s27, 512  ;;  %p285_p12 = scmp.lt.s32.totalorder %s29_s27, %s29_s27 }
  0x1b   :  { %p281_p11 = scmp.ne.s32.totalorder %s29_s27, %s280_s8  ;;  %p286_p13 = scmp.lt.s32.totalorder %s280_s8, %s280_s8 }
  0x1d   :  { %p287_p0 = por %p286_p13, %p285_p12 }
  0x1f   :  { %p288_p1 = pnand %p287_p0, %p281_p11 }
  0x21   :  { %291 = shalt.err (!%p288_p1)
}
  0x22   :  { %34 = dma.hbm_to_vmem [thread:$0]  %s402_s1, 512, %s29_s27, [#allocation7], %s321_s22, %s321_s22, %s322_s23  }
  0x23   :  { %314 = dma.done.wait [#allocation4], 256  }
  0x24   :  { %315 = vsyncadd [#allocation4], 4294967040 }
  0x25   :  { %316 = dma.done.wait [#allocation7], 512  }
  0x26   :  { %317 = vsyncadd [#allocation7], 4294966784  ;;  %vm48_vm0 = vcmask 523264   ;;  %v324_v0 = vmov 0.0   ;;  %v242_v1 = vld [vmem:[#allocation6] sm:$0xff]   ;;  %v243_v2 = vld [vmem:[#allocation6 + $0x8] sm:$0xff]  }
  0x27   :  { %51 = vst.msk [vmem:[#allocation2 + $0x10] sm:$0xff] %vm48_vm0, %v324_v0  ;;  %49 = vst.msk [vmem:[#allocation2] sm:$0xff] %vm48_vm0, %v324_v0  ;;  %222 = vmatprep.subr.bf16.mxu0 %v242_v1  ;;  %v244_v3 = vld [vmem:[#allocation6 + $0x10] sm:$0xff]   ;;  %v245_v5 = vld [vmem:[#allocation6 + $0x18] sm:$0xff]   ;;  %s325_s11 = smov [#allocation8]  }
  0x28   :  { %50 = vst.msk [vmem:[#allocation2 + $0x8] sm:$0xff] %vm48_vm0, %v324_v0  ;;  %52 = vst.msk [vmem:[#allocation2 + $0x18] sm:$0xff] %vm48_vm0, %v324_v0  ;;  %223 = vmatpush3.bf16.msra.mxu0 %v242_v1  ;;  %v246_v4 = vld [vmem:[#allocation3] sm:$0xff]   ;;  %v247_v6 = vld [vmem:[#allocation3 + $0x8] sm:$0xff]   ;;  %s194_s12 = sshll.u32 %s325_s11, 4  ;;  %s195_s12 = int_to_ptr.vmem [resolvable:$true] %s194_s12 }
  0x29   :  { %224 = vmatprep.subr.bf16.mxu0 %v243_v2  ;;  %230 = vmatprep.mubr.msk.bf16.mxu0 %vm48_vm0, %v246_v4  ;;  %v215_v19 = vld [vmem:[%s403_s2] ss:$0 sm:$0xff]  ;;  %s292_s2 = scalar_lea.vmem %s195_s12, 512  ;;  %p297_p3 = scmp.lt.s32.totalorder %s195_s12, %s195_s12 }
  0x2a   :  { %p293_p2 = scmp.ne.s32.totalorder %s195_s12, %s292_s2  ;;  %p298_p4 = scmp.lt.s32.totalorder %s292_s2, %s292_s2 }
  0x2c   :  { %225 = vmatpush3.bf16.msra.mxu0 %v243_v2  ;;  %p299_p5 = por %p298_p4, %p297_p3 }
  0x2d   :  { %226 = vmatprep.subr.bf16.mxu0 %v244_v3 }
  0x2e   :  { %v55_v7 = vld [vmem:[#allocation2 + $0x10] sm:$0xff]  ;;  %v53_v8 = vld [vmem:[#allocation2] sm:$0xff]  ;;  %p300_p6 = pnand %p299_p5, %p293_p2 }
  0x2f   :  { %v56_v10 = vld [vmem:[#allocation2 + $0x18] sm:$0xff]  ;;  %v54_v13 = vld [vmem:[#allocation2 + $0x8] sm:$0xff] }
  0x30   :  { %227 = vmatpush3.bf16.msra.mxu0 %v244_v3 }
  0x31   :  { %228 = vmatprep.subr.bf16.mxu0 %v245_v5 }
  0x34   :  { %229 = vmatpush3.bf16.msra.mxu0 %v245_v5 }
  0x37   :  { %231 = vmatmul.mubr.msk.bf16.vlgmr.msra.gmra.mrb[0].mxu0 %vm48_vm0, %v247_v6 }
 0x10a   :  { %v232_v9 = vpop.f32.mrb[0].mxu0 }
 0x10b   :  { %v161_v11 = vadd.f32 %v232_v9, %v55_v7  ;;  %v144_v12 = vpop.f32.mrb[1].mxu0 }
 0x10c   :  { %v159_v14 = vadd.f32 %v144_v12, %v53_v8  ;;  %v233_v15 = vpop.f32.mrb[2].mxu0 }
 0x10d   :  { %165 = vst.msk [vmem:[#allocation2 + $0x10] sm:$0xff] %vm48_vm0, %v161_v11  ;;  %v162_v16 = vadd.f32 %v233_v15, %v56_v10  ;;  %v147_v17 = vpop.f32.mrb[3].mxu0 }
 0x10e   :  { %163 = vst.msk [vmem:[#allocation2] sm:$0xff] %vm48_vm0, %v159_v14  ;;  %v160_v18 = vadd.f32 %v147_v17, %v54_v13 }
 0x10f   :  { %166 = vst.msk [vmem:[#allocation2 + $0x18] sm:$0xff] %vm48_vm0, %v162_v16 }
 0x110   :  { %164 = vst.msk [vmem:[#allocation2 + $0x8] sm:$0xff] %vm48_vm0, %v160_v18 }
 0x114   :  { %v172_v20 = vld [vmem:[#allocation2 + $0x10] sm:$0xff] }
 0x115   :  { %v170_v21 = vld [vmem:[#allocation2] sm:$0xff]  ;;  %v183_v22 = vadd.f32 %v215_v19, %v172_v20 }
 0x116   :  { %v173_v23 = vld [vmem:[#allocation2 + $0x18] sm:$0xff]  ;;  %v181_v24 = vadd.f32 %v215_v19, %v170_v21 }
 0x117   :  { %v171_v25 = vld [vmem:[#allocation2 + $0x8] sm:$0xff]  ;;  %v184_v26 = vadd.f32 %v215_v19, %v173_v23  ;;  %187 = vst.msk [vmem:[#allocation8 + $0x10] sm:$0xff] %vm48_vm0, %v183_v22 }
 0x118   :  { %v182_v27 = vadd.f32 %v215_v19, %v171_v25  ;;  %185 = vst.msk [vmem:[#allocation8] sm:$0xff] %vm48_vm0, %v181_v24 }
 0x119   :  { %188 = vst.msk [vmem:[#allocation8 + $0x18] sm:$0xff] %vm48_vm0, %v184_v26 }
 0x11a   :  { %186 = vst.msk [vmem:[#allocation8 + $0x8] sm:$0xff] %vm48_vm0, %v182_v27 }
 0x11b   :  { %303 = shalt.err (!%p300_p6)
}
 0x11c   :  { %s304_s15 = scalar_lea.hbm %s404_s3, 512 }
 0x11d   :  { %p305_p7 = scmp.ne.s32.totalorder %s404_s3, %s304_s15  ;;  %p308_p8 = scmp.lt.u32.totalorder %s304_s15, %s404_s3 }
 0x11f   :  { %p310_p9 = pnand %p308_p8, %p305_p7 }
 0x121   :  { %313 = shalt.err (!%p310_p9)
}
 0x122   :  { %s326_s20 = smov 128   ;;  %s327_s21 = smov 8  }
 0x123   :  { %200 = dma.vmem_to_hbm [thread:$0]  %s195_s12, 512, %s404_s3, [#allocation5], %s326_s20, %s326_s20, %s327_s21  }
 0x124   :  { %318 = dma.done.wait [#allocation5], 512  }
 0x125   :  { %319 = vsyncadd [#allocation5], 4294966784 }
 0x126   :  { %204 = vsyncpa [#allocation4], 1 }
 0x127   :  { %205 = vsyncpa [#allocation7], 1 }
 0x128   :  { %206 = vsyncpa [#allocation5], 1 }

</bundles_post_ra>
